<compile_context>
chip_gen: v5e
topology: v5e:2x2
jax: 0.10.0
libtpu: 0.0.40
codegen_flags: <defaults>
</compile_context>

<pallas_src>
import jax
import jax.numpy as jnp
from jax.experimental import pallas as pl
from jax.experimental.pallas import tpu as pltpu

HIDDEN = 64


def policy_block_kernel(x_ref, w1_ref, b1_ref, w2t_ref, b2t_ref, ot_ref):
    # x:   (TB, D)  compute_dtype (bf16 by default)   w1: (D, H) compute_dtype
    # b1:  (1, H)   f32                               w2t: (A, H) f32
    # b2t: (A, 1)   f32                               ot: (A, TB) f32  (lane-dense output)
    x = x_ref[...]
    # First linear + ReLU: MXU matmul with f32 accumulation; bias/ReLU on the VPU in f32.
    h = jnp.dot(x, w1_ref[...], preferred_element_type=jnp.float32) + b1_ref[...]
    h = jnp.maximum(h, 0.0)                                   # (TB, H) f32
    # Second linear, emitted transposed: contract the hidden axis of w2^T (A, H) with the
    # hidden axis of h (TB, H) -> (A, TB). This is the standard "NT" matmul form (no
    # explicit transpose in the kernel) and gives a lane-dense output block.
    out_t = jax.lax.dot_general(
        w2t_ref[...], h,
        dimension_numbers=(((1,), (1,)), ((), ())),
        preferred_element_type=jnp.float32,
    ) + b2t_ref[...]                                          # (A, TB) + (A, 1)
    ot_ref[...] = out_t.astype(ot_ref.dtype)


def _round_up(x, m):
    return ((x + m - 1) // m) * m


def policy_block(latent, w1, b1, w2, b2, *, tb=8192, compute_dtype=jnp.bfloat16):
    """relu(latent @ w1 + b1) @ w2 + b2, tiled over the batch dimension."""
    B, D = latent.shape
    H = w1.shape[1]            # 64
    A = w2.shape[1]            # action_dim
    assert w1.shape == (D, H)
    assert w2.shape == (H, A)
    assert b1.shape[-1] == H and b2.shape[-1] == A

    # ---- batch tile selection ------------------------------------------------------
    # TB is a multiple of 128: satisfies bf16 (16,128) sublane packing on the input tile
    # and makes the transposed (A, TB) output block lane-dense (unmasked stores).
    Bp0 = _round_up(B, 128)
    TB = _round_up(min(int(tb), Bp0), 128)
    # v7x megacore: the "parallel" batch axis is sharded across 2 TensorCores, so make
    # sure there are at least 2 tiles once the batch is big enough to split.
    if Bp0 >= 256 and Bp0 // TB < 2:
        TB = _round_up((Bp0 + 1) // 2, 128)
    Bp = _round_up(B, TB)
    if Bp != B:
        latent = jnp.pad(latent, ((0, Bp - B), (0, 0)))
    grid = (Bp // TB,)

    # ---- operand prep (tiny, wrapper-side) -----------------------------------------
    x_in = latent.astype(compute_dtype)            # big HBM stream -> bf16 halves reads
    w1_in = w1.astype(compute_dtype)               # VMEM-resident, matches MXU bf16 path
    b1_2d = b1.reshape(1, H).astype(jnp.float32)
    w2_t = jnp.transpose(w2).astype(jnp.float32)   # (A, H): tiny, stays f32
    b2_t = b2.reshape(A, 1).astype(jnp.float32)
    x_itemsize = jnp.dtype(compute_dtype).itemsize

    # ---- VMEM budget (lane/sublane-padded, double-buffered) ------------------------
    vmem_est = (
        2 * TB * 128 * x_itemsize      # x tiles: D lane-padded to 128
        + 2 * 8 * TB * 4               # out tiles: A sublane-padded to 8 (transposed layout)
        + 4 * 128 * 128 * 4            # weights/biases, generous
    )
    vmem_limit = int(max(16 * 1024 * 1024, min(2 * vmem_est, 32 * 1024 * 1024)))

    cost = pl.CostEstimate(
        flops=2 * Bp * (D * H + H * A),
        transcendentals=0,
        bytes_accessed=(Bp * D * x_itemsize + Bp * A * 4
                        + D * H * x_itemsize + (H + H * A + A) * 4),
    )

    out_t = pl.pallas_call(
        policy_block_kernel,
        out_shape=jax.ShapeDtypeStruct((A, Bp), jnp.float32),
        grid_spec=pltpu.PrefetchScalarGridSpec(
            num_scalar_prefetch=0,
            grid=grid,
            in_specs=[
                pl.BlockSpec((TB, D), lambda i: (i, 0)),   # streamed per batch tile
                pl.BlockSpec((D, H), lambda i: (0, 0)),    # VMEM-resident weights/biases
                pl.BlockSpec((1, H), lambda i: (0, 0)),
                pl.BlockSpec((A, H), lambda i: (0, 0)),
                pl.BlockSpec((A, 1), lambda i: (0, 0)),
            ],
            out_specs=pl.BlockSpec((A, TB), lambda i: (0, i)),  # lane-dense (A, TB) block
        ),
        compiler_params=pltpu.CompilerParams(
            dimension_semantics=("parallel",),   # independent batch tiles -> megacore
            vmem_limit_bytes=vmem_limit,
        ),
        cost_estimate=cost,
    )(x_in, w1_in, b1_2d, w2_t, b2_t)

    # Drop padded rows, transpose the tiny (A, B) result back to (B, A).
    return jnp.transpose(out_t[:, :B])


def init_params(key, input_dim, action_dim, hidden=HIDDEN):
    # Deterministic synthetic init (shapes match nn.Linear(input_dim, 64), nn.Linear(64, action_dim)).
    k1, k2, k3, k4 = jax.random.split(key, 4)
    s1 = 1.0 / jnp.sqrt(input_dim)
    s2 = 1.0 / jnp.sqrt(hidden)
    w1 = jax.random.uniform(k1, (input_dim, hidden), jnp.float32, -s1, s1)
    b1 = jax.random.uniform(k2, (hidden,), jnp.float32, -s1, s1)
    w2 = jax.random.uniform(k3, (hidden, action_dim), jnp.float32, -s2, s2)
    b2 = jax.random.uniform(k4, (action_dim,), jnp.float32, -s2, s2)
    return w1, b1, w2, b2


def _reference(latent, w1, b1, w2, b2):
    return jnp.maximum(latent @ w1 + b1, 0.0) @ w2 + b2


if __name__ == "__main__":
    key = jax.random.PRNGKey(0)
    k_x, k_p, k_x2 = jax.random.split(key, 3)

    # Small test consistent with the module: batch=8, input_dim=32, action_dim=4.
    B, input_dim, action_dim = 8, 32, 4
    latent = jax.random.normal(k_x, (B, input_dim), jnp.float32)
    w1, b1, w2, b2 = init_params(k_p, input_dim, action_dim)
    ref = _reference(latent, w1, b1, w2, b2)

    # Exact-path check (f32 compute dtype, single tile).
    out_f32 = jax.block_until_ready(
        policy_block(latent, w1, b1, w2, b2, compute_dtype=jnp.float32))
    assert out_f32.shape == (B, action_dim)
    assert jnp.allclose(out_f32, ref, atol=1e-5, rtol=1e-5)

    # Default bf16-input path (f32 accumulation) -> looser tolerance.
    out_bf = jax.block_until_ready(policy_block(latent, w1, b1, w2, b2))
    assert out_bf.shape == (B, action_dim)
    assert jnp.allclose(out_bf, ref, atol=3e-2, rtol=3e-2)

    # Multi-tile path: B=300 -> TB=256, Bp=512, grid=(2,) (exercises padding + >=2-tile split).
    B2 = 300
    latent2 = jax.random.normal(k_x2, (B2, input_dim), jnp.float32)
    ref2 = _reference(latent2, w1, b1, w2, b2)
    out2 = jax.block_until_ready(policy_block(latent2, w1, b1, w2, b2))
    assert out2.shape == (B2, action_dim)
    assert jnp.allclose(out2, ref2, atol=3e-2, rtol=3e-2)

    print("KERNEL_OK")
</pallas_src>

<mosaic_0001>
module attributes {stable_mosaic.version = 11 : i64} {
  func.func @policy_block_kernel(%arg0: i32, %arg1: memref<128x32xf32, #tpu.memory_space<vmem>>, %arg2: memref<32x64xf32, #tpu.memory_space<vmem>>, %arg3: memref<1x64xf32, #tpu.memory_space<vmem>>, %arg4: memref<4x64xf32, #tpu.memory_space<vmem>>, %arg5: memref<4x1xf32, #tpu.memory_space<vmem>>, %arg6: memref<4x128xf32, #tpu.memory_space<vmem>>) attributes {dimension_semantics = [#tpu.dimension_semantics<parallel>], iteration_bounds = array<i64: 1>, scalar_prefetch = 0 : i64, scratch_operands = 0 : i64, tpu.core_type = #tpu.core_type<tc>, window_params = [{transform_indices = @transform_0, window_bounds = array<i64: 128, 32>}, {pipeline_mode = #tpu.pipeline_mode<synchronous>, transform_indices = @transform_1, window_bounds = array<i64: 32, 64>}, {pipeline_mode = #tpu.pipeline_mode<synchronous>, transform_indices = @transform_2, window_bounds = array<i64: 1, 64>}, {pipeline_mode = #tpu.pipeline_mode<synchronous>, transform_indices = @transform_3, window_bounds = array<i64: 4, 64>}, {pipeline_mode = #tpu.pipeline_mode<synchronous>, transform_indices = @transform_4, window_bounds = array<i64: 4, 1>}, {transform_indices = @transform_5, window_bounds = array<i64: 4, 128>}]} {
    %c0 = arith.constant 0 : index
    %c0_0 = arith.constant 0 : index
    %0 = vector.load %arg1[%c0, %c0_0] : memref<128x32xf32, #tpu.memory_space<vmem>>, vector<128x32xf32>
    %c0_1 = arith.constant 0 : index
    %c0_2 = arith.constant 0 : index
    %1 = vector.load %arg2[%c0_1, %c0_2] : memref<32x64xf32, #tpu.memory_space<vmem>>, vector<32x64xf32>
    %cst = arith.constant dense<0.000000e+00> : vector<128x64xf32>
    %2 = tpu.matmul %0, %1, %cst {dimension_numbers = #tpu.dot_dimension_numbers<[1], [0], [0], [1], [0, 0, 1, 1], [], []>} : vector<128x32xf32>, vector<32x64xf32>, vector<128x64xf32> -> vector<128x64xf32>
    %c0_3 = arith.constant 0 : index
    %c0_4 = arith.constant 0 : index
    %3 = vector.load %arg3[%c0_3, %c0_4] : memref<1x64xf32, #tpu.memory_space<vmem>>, vector<1x64xf32>
    %4 = vector.broadcast %3 : vector<1x64xf32> to vector<128x64xf32>
    %5 = arith.addf %2, %4 : vector<128x64xf32>
    %cst_5 = arith.constant 0.000000e+00 : f32
    %6 = vector.broadcast %cst_5 : f32 to vector<128x64xf32>
    %7 = arith.maximumf %5, %6 : vector<128x64xf32>
    %c0_6 = arith.constant 0 : index
    %c0_7 = arith.constant 0 : index
    %8 = vector.load %arg4[%c0_6, %c0_7] : memref<4x64xf32, #tpu.memory_space<vmem>>, vector<4x64xf32>
    %cst_8 = arith.constant dense<0.000000e+00> : vector<4x128xf32>
    %9 = tpu.matmul %8, %7, %cst_8 {dimension_numbers = #tpu.dot_dimension_numbers<[1], [1], [0], [0], [0, 0, 1, 0], [], []>} : vector<4x64xf32>, vector<128x64xf32>, vector<4x128xf32> -> vector<4x128xf32>
    %c0_9 = arith.constant 0 : index
    %c0_10 = arith.constant 0 : index
    %10 = vector.load %arg5[%c0_9, %c0_10] : memref<4x1xf32, #tpu.memory_space<vmem>>, vector<4x1xf32>
    %11 = vector.broadcast %10 : vector<4x1xf32> to vector<4x128xf32>
    %12 = arith.addf %9, %11 : vector<4x128xf32>
    %c0_11 = arith.constant 0 : index
    %c0_12 = arith.constant 0 : index
    %13 = vector.load %arg6[%c0_11, %c0_12] : memref<4x128xf32, #tpu.memory_space<vmem>>, vector<4x128xf32>
    tpu.vector_store %arg6[%c0_11, %c0_12], %12 {strides = array<i32>} : memref<4x128xf32, #tpu.memory_space<vmem>>, vector<4x128xf32>,
    return
  }
  func.func @transform_0(%arg0: i32) -> (i32, i32) {
    %c0_i32 = arith.constant 0 : i32
    %c0_i32_0 = arith.constant 0 : i32
    return %arg0, %c0_i32 : i32, i32
  }
  func.func @transform_1(%arg0: i32) -> (i32, i32) {
    %c0_i32 = arith.constant 0 : i32
    %c0_i32_0 = arith.constant 0 : i32
    %c0_i32_1 = arith.constant 0 : i32
    return %c0_i32, %c0_i32_0 : i32, i32
  }
  func.func @transform_2(%arg0: i32) -> (i32, i32) {
    %c0_i32 = arith.constant 0 : i32
    %c0_i32_0 = arith.constant 0 : i32
    %c0_i32_1 = arith.constant 0 : i32
    return %c0_i32, %c0_i32_0 : i32, i32
  }
  func.func @transform_3(%arg0: i32) -> (i32, i32) {
    %c0_i32 = arith.constant 0 : i32
    %c0_i32_0 = arith.constant 0 : i32
    %c0_i32_1 = arith.constant 0 : i32
    return %c0_i32, %c0_i32_0 : i32, i32
  }
  func.func @transform_4(%arg0: i32) -> (i32, i32) {
    %c0_i32 = arith.constant 0 : i32
    %c0_i32_0 = arith.constant 0 : i32
    %c0_i32_1 = arith.constant 0 : i32
    return %c0_i32, %c0_i32_0 : i32, i32
  }
  func.func @transform_5(%arg0: i32) -> (i32, i32) {
    %c0_i32 = arith.constant 0 : i32
    %c0_i32_0 = arith.constant 0 : i32
    return %c0_i32, %arg0 : i32, i32
  }
}

</mosaic_0001>

<bundles_post_ra>
// kernel: tpu_custom_call.1
= control target key start
LH: loop header
LB: loop body
LE: loop exit
PB: predicated region body
PF: predicated region fallthrough
CT: control target
= control target key end

     0   :  { %vm45_vm0 = vcmask 261120   ;;  %s482_s0 = inlined_call_operand.vmem [shape: f32[128,32], index: 0, kind: input, shape index: {}]   ;;  %s483_s1 = inlined_call_operand.vmem [shape: f32[32,64], index: 1, kind: input, shape index: {}]   ;;  %s484_s2 = inlined_call_operand.vmem [shape: f32[1,64], index: 2, kind: input, shape index: {}]   ;;  %s485_s3 = inlined_call_operand.vmem [shape: f32[4,64], index: 3, kind: input, shape index: {}]   ;;  %s486_s4 = inlined_call_operand.vmem [shape: f32[4,1], index: 4, kind: input, shape index: {}]   ;;  %s487_s5 = inlined_call_operand.hbm [shape: f32[4,128], index: 5, kind: output, shape index: {}]  }
   0x1   :  { %v40_v0 = vld [vmem:[%s483_s1 + $0x18] sm:$0xff]  ;;  %v39_v1 = vld [vmem:[%s483_s1 + $0x10] sm:$0xff]  ;;  %v38_v2 = vld [vmem:[%s483_s1 + $0x8] sm:$0xff] }
   0x2   :  { %304 = vmatpush.msra.mxu2 %v40_v0  ;;  %305 = vmatpush.msra.mxu3 %v40_v0  ;;  %v37_v3 = vld [vmem:[%s483_s1] sm:$0xff]  ;;  %v27_v4 = vld [vmem:[%s482_s0 + $0x30] sm:$0xff] }
   0x3   :  { %106 = vmatpush.msra.mxu0 %v40_v0  ;;  %v33_v5 = vld [vmem:[%s482_s0 + $0x60] sm:$0xff] }
   0x4   :  { %306 = vmatpush.msra.mxu2 %v39_v1  ;;  %307 = vmatpush.msra.mxu3 %v39_v1 }
   0x5   :  { %107 = vmatpush.msra.mxu0 %v39_v1 }
   0x6   :  { %308 = vmatpush.msra.mxu2 %v38_v2  ;;  %309 = vmatpush.msra.mxu3 %v38_v2 }
   0x7   :  { %10 = vsyncpa [#allocation3], 0  ;;  %108 = vmatpush.msra.mxu0 %v38_v2  ;;  %v21_v6 = vld [vmem:[%s482_s0] sm:$0xff]  ;;  %v28_v7 = vld [vmem:[%s482_s0 + $0x38] sm:$0xff]  ;;  %vm182_vm1 = vcmask 523264   ;;  %v342_v58 = vmov 0  }
   0x8   :  { %310 = vmatpush.msra.mxu2 %v37_v3  ;;  %311 = vmatpush.msra.mxu3 %v37_v3  ;;  %v34_v8 = vld [vmem:[%s482_s0 + $0x68] sm:$0xff]  ;;  %v29_v10 = vld [vmem:[%s482_s0 + $0x40] sm:$0xff]  ;;  %v35_v11 = vld [vmem:[%s482_s0 + $0x70] sm:$0xff]  ;;  %s343_s9 = smov [#allocation2]   ;;  %s262_s13 = sshll.u32 %s487_s5, 4  ;;  %s263_s13 = int_to_ptr.hbm [resolvable:$true] %s262_s13 }
   0x9   :  { %277 = vmatmul.msk.f32.vlgmr.msra.gmra.mxu2 %vm45_vm0, %v27_v4  ;;  %283 = vmatmul.msk.f32.vlgmr.msra.gmra.mxu3 %vm45_vm0, %v33_v5  ;;  %v22_v9 = vld [vmem:[%s482_s0 + $0x8] sm:$0xff]  ;;  %v23_v12 = vld [vmem:[%s482_s0 + $0x10] sm:$0xff]  ;;  %v36_v14 = vld [vmem:[%s482_s0 + $0x78] sm:$0xff]  ;;  %s260_s10 = sshll.u32 %s343_s9, 4  ;;  %s261_s10 = int_to_ptr.vmem [resolvable:$true] %s260_s10 }
   0xa   :  { %109 = vmatpush.msra.mxu0 %v37_v3  ;;  %v30_v13 = vld [vmem:[%s482_s0 + $0x48] sm:$0xff]  ;;  %v24_v15 = vld [vmem:[%s482_s0 + $0x18] sm:$0xff]  ;;  %v31_v16 = vld [vmem:[%s482_s0 + $0x50] sm:$0xff]  ;;  %314 = vset.pattern.permute.xlu0 %v342_v58 }
   0xb   :  { %271 = vmatmul.msk.f32.vlgmr.msra.gmra.mxu0 %vm45_vm0, %v21_v6  ;;  %v25_v17 = vld [vmem:[%s482_s0 + $0x20] sm:$0xff]  ;;  %v32_v18 = vld [vmem:[%s482_s0 + $0x58] sm:$0xff]  ;;  %v26_v19 = vld [vmem:[%s482_s0 + $0x28] sm:$0xff] }
   0xc   :  { %v315_v28 = vld [vmem:[%s484_s2] ss:$0 sm:$0xff] }
   0xd   :  { %v176_v56 = vld [vmem:[%s486_s4] sm:$0xf] }
   0xe   :  { %179 = vperm.xlu0 %314, %v176_v56  }
  0x11   :  { %278 = vmatmul.msk.f32.gmra.mxu2 %vm45_vm0, %v28_v7  ;;  %284 = vmatmul.msk.f32.gmra.mxu3 %vm45_vm0, %v34_v8  ;;  %v175_v7 = vld [vmem:[%s485_s3] sm:$0xf] }
  0x13   :  { %272 = vmatmul.msk.f32.gmra.mxu0 %vm45_vm0, %v22_v9 }
  0x19   :  { %279 = vmatmul.msk.f32.gmra.mxu2 %vm45_vm0, %v29_v10  ;;  %285 = vmatmul.msk.f32.gmra.mxu3 %vm45_vm0, %v35_v11 }
  0x1b   :  { %273 = vmatmul.msk.f32.gmra.mxu0 %vm45_vm0, %v23_v12 }
  0x21   :  { %280 = vmatmul.msk.f32.gmra.mxu2 %vm45_vm0, %v30_v13  ;;  %286 = vmatmul.msk.f32.gmra.mxu3 %vm45_vm0, %v36_v14 }
  0x23   :  { %274 = vmatmul.msk.f32.gmra.mxu0 %vm45_vm0, %v24_v15 }
  0x29   :  { %281 = vmatmul.msk.f32.gmra.mxu2 %vm45_vm0, %v31_v16 }
  0x2b   :  { %275 = vmatmul.msk.f32.gmra.mxu0 %vm45_vm0, %v25_v17 }
  0x31   :  { %282 = vmatmul.msk.f32.gmra.mxu2 %vm45_vm0, %v32_v18 }
  0x33   :  { %276 = vmatmul.msk.f32.gmra.mxu0 %vm45_vm0, %v26_v19 }
  0x80   :  { %v180_v8 = vpop.permute.xlu0 %179 }
  0x88   :  { %v450_v22 = vpop.f32.mrf.mxu0 }
  0x89   :  { %v112_v4 = vadd.f32 %v315_v28, %v450_v22 }
  0x8b   :  { %v159_v6 = vmax.f32 %v112_v4, 0.0 }
  0x8c   :  { %v129_v20 = vpop.f32.mrf.mxu2  ;;  %v147_v21 = vpop.f32.mrf.mxu3 }
  0x8d   :  { %v148_v38 = vadd.f32 %v315_v28, %v147_v21  ;;  %v130_v54 = vadd.f32 %v315_v28, %v129_v20 }
  0x8f   :  { %v171_v41 = vmax.f32 %v148_v38, 0.0  ;;  %v165_v59 = vmax.f32 %v130_v54, 0.0 }
  0x90   :  { %v114_v27 = vpop.f32.mrf.mxu0 }
  0x91   :  { %v115_v2 = vadd.f32 %v315_v28, %v114_v27 }
  0x93   :  { %v160_v5 = vmax.f32 %v115_v2, 0.0 }
  0x94   :  { %v132_v23 = vpop.f32.mrf.mxu2  ;;  %v150_v24 = vpop.f32.mrf.mxu3 }
  0x95   :  { %v151_v35 = vadd.f32 %v315_v28, %v150_v24  ;;  %v133_v51 = vadd.f32 %v315_v28, %v132_v23 }
  0x97   :  { %v172_v39 = vmax.f32 %v151_v35, 0.0  ;;  %v166_v55 = vmax.f32 %v133_v51, 0.0 }
  0x98   :  { %v117_v34 = vpop.f32.mrf.mxu0 }
  0x99   :  { %v118_v0 = vadd.f32 %v315_v28, %v117_v34 }
  0x9b   :  { %v161_v3 = vmax.f32 %v118_v0, 0.0 }
  0x9c   :  { %v135_v25 = vpop.f32.mrf.mxu2  ;;  %v153_v26 = vpop.f32.mrf.mxu3 }
  0x9d   :  { %v154_v32 = vadd.f32 %v315_v28, %v153_v26  ;;  %v136_v49 = vadd.f32 %v315_v28, %v135_v25 }
  0x9f   :  { %v173_v36 = vmax.f32 %v154_v32, 0.0  ;;  %v167_v52 = vmax.f32 %v136_v49, 0.0 }
  0xa0   :  { %v120_v40 = vpop.f32.mrf.mxu0 }
  0xa1   :  { %v121_v62 = vadd.f32 %v315_v28, %v120_v40 }
  0xa3   :  { %v162_v1 = vmax.f32 %v121_v62, 0.0 }
  0xa4   :  { %v138_v29 = vpop.f32.mrf.mxu2  ;;  %v156_v30 = vpop.f32.mrf.mxu3 }
  0xa5   :  { %v157_v31 = vadd.f32 %v315_v28, %v156_v30  ;;  %v139_v46 = vadd.f32 %v315_v28, %v138_v29 }
  0xa7   :  { %v174_v33 = vmax.f32 %v157_v31, 0.0  ;;  %v168_v50 = vmax.f32 %v139_v46, 0.0 }
  0xa8   :  { %v123_v48 = vpop.f32.mrf.mxu0 }
  0xa9   :  { %287 = vmatpush.xpose.msk.msra.mxu1 %vm182_vm1, %v174_v33  ;;  %v124_v61 = vadd.f32 %v315_v28, %v123_v48 }
  0xab   :  { %v163_v63 = vmax.f32 %v124_v61, 0.0 }
  0xac   :  { %v141_v37 = vpop.f32.mrf.mxu2 }
  0xad   :  { %288 = vmatpush.xpose.msk.msra.mxu1 %vm182_vm1, %v173_v36  ;;  %v142_v44 = vadd.f32 %v315_v28, %v141_v37 }
  0xaf   :  { %v169_v47 = vmax.f32 %v142_v44, 0.0 }
  0xb0   :  { %v126_v53 = vpop.f32.mrf.mxu0 }
  0xb1   :  { %289 = vmatpush.xpose.msk.msra.mxu1 %vm182_vm1, %v172_v39  ;;  %v127_v57 = vadd.f32 %v315_v28, %v126_v53 }
  0xb3   :  { %v164_v60 = vmax.f32 %v127_v57, 0.0 }
  0xb4   :  { %v144_v42 = vpop.f32.mrf.mxu2 }
  0xb5   :  { %v145_v43 = vadd.f32 %v315_v28, %v144_v42  ;;  %290 = vmatpush.xpose.msk.msra.mxu1 %vm182_vm1, %v171_v41 }
  0xb7   :  { %v170_v45 = vmax.f32 %v145_v43, 0.0 }
  0xb9   :  { %291 = vmatpush.xpose.msk.msra.mxu1 %vm182_vm1, %v170_v45 }
  0xbd   :  { %292 = vmatpush.xpose.msk.msra.mxu1 %vm182_vm1, %v169_v47 }
  0xc1   :  { %293 = vmatpush.xpose.msk.msra.mxu1 %vm182_vm1, %v168_v50 }
  0xc5   :  { %294 = vmatpush.xpose.msk.msra.mxu1 %vm182_vm1, %v167_v52 }
  0xc9   :  { %295 = vmatpush.xpose.msk.msra.mxu1 %vm182_vm1, %v166_v55 }
  0xcd   :  { %296 = vmatpush.xpose.msk.msra.mxu1 %vm182_vm1, %v165_v59 }
  0xd1   :  { %297 = vmatpush.xpose.msk.msra.mxu1 %vm182_vm1, %v164_v60 }
  0xd5   :  { %298 = vmatpush.xpose.msk.msra.mxu1 %vm182_vm1, %v163_v63 }
  0xd9   :  { %299 = vmatpush.xpose.msk.msra.mxu1 %vm182_vm1, %v162_v1 }
  0xdd   :  { %300 = vmatpush.xpose.msk.msra.mxu1 %vm182_vm1, %v161_v3 }
  0xe1   :  { %301 = vmatpush.xpose.msk.msra.mxu1 %vm182_vm1, %v160_v5 }
  0xe5   :  { %302 = vmatpush.xpose.msk.msra.mxu1 %vm182_vm1, %v159_v6 }
  0xe8   :  { %303 = vmatmul.msk.f32.vlgmr.msra.gmra.mxu1 %vm182_vm1, %v175_v7 }
 0x165   :  { %v251_v9 = vpop.f32.mrf.mxu1 }
 0x166   :  { %v252_v10 = vadd.f32 %v251_v9, %v180_v8 }
 0x168   :  { %254 = vst [vmem:[#allocation2] sm:$0xf] %v252_v10 }
 0x169   :  { %265 = dma.vmem_to_hbm [thread:$0]  %s261_s10, 64, %s263_s13, [#allocation3]  }
 0x16a   :  { %340 = dma.done.wait [#allocation3], 64  }
 0x16b   :  { %341 = vsyncadd [#allocation3], 4294967232 }
 0x16c   :  { %270 = vsyncpa [#allocation3], 1 }

</bundles_post_ra>
